<compile_context>
chip_gen: v5e
topology: v5e:2x2
jax: 0.10.0
libtpu: 0.0.40
codegen_flags: <defaults>
</compile_context>

<pallas_src>
import jax
import jax.numpy as jnp
import numpy as np
from jax import lax
from jax.experimental import pallas as pl
from jax.experimental.pallas import tpu as pltpu


def _round_up(x, m):
    return ((x + m - 1) // m) * m


def _pad_to(x, shape):
    pads = [(0, t - s) for s, t in zip(x.shape, shape)]
    if any(p[1] for p in pads):
        x = jnp.pad(x, pads)
    return x


def _mlm_head_kernel(x_ref, w_ref, b_ref, o_ref, acc_ref):
    # x_ref: (tm, tk)   w_ref: (tn, tk)  [n_items, emb] layout, no transpose
    # b_ref: (1, tn)    o_ref: (tm, tn)  acc_ref: (tm, tn) f32 scratch
    k = pl.program_id(2)

    @pl.when(k == 0)
    def _():
        acc_ref[...] = jnp.zeros_like(acc_ref)

    # Contract the shared emb_dim axis of x (dim 1) and w (dim 1): x @ w.T on MXU.
    acc_ref[...] += lax.dot_general(
        x_ref[...],
        w_ref[...],
        dimension_numbers=(((1,), (1,)), ((), ())),
        preferred_element_type=jnp.float32,
    )

    @pl.when(k == pl.num_programs(2) - 1)
    def _():
        o_ref[...] = (acc_ref[...] + b_ref[...]).astype(o_ref.dtype)


def mlm_head(hidden_states, decoder_weight, bias, *,
             tm=256, tn=1024, tk=512,
             compute_dtype=jnp.bfloat16):
    """hidden_states: [B, S, E]; decoder_weight: [N, E]; bias: [N] -> [B, S, N].

    compute_dtype: dtype fed to the MXU (accumulation is always f32).  Use
    jnp.float32 for exact parity with the PyTorch f32 module; bf16 (default)
    halves HBM weight traffic and doubles MXU throughput on v6e/v7x.
    """
    B, S, E = hidden_states.shape
    N, E_w = decoder_weight.shape
    assert E_w == E, "decoder_weight must be [n_items, emb_dim]"
    assert bias.shape == (N,)
    out_dtype = hidden_states.dtype

    M = B * S

    # Clamp tiles to (padded) problem extents, respecting (8, 128) alignment.
    tm = min(tm, _round_up(M, 8))
    tn = min(tn, _round_up(N, 128))
    tk = min(tk, _round_up(E, 128))
    M_pad = _round_up(M, tm)
    N_pad = _round_up(N, tn)
    E_pad = _round_up(E, tk)

    x2d = hidden_states.reshape(M, E)
    w = decoder_weight
    if compute_dtype is not None:
        x2d = x2d.astype(compute_dtype)
        w = w.astype(compute_dtype)

    x2d = _pad_to(x2d, (M_pad, E_pad))          # zero-padding: no effect on matmul
    w = _pad_to(w, (N_pad, E_pad))
    b2d = _pad_to(bias.astype(jnp.float32).reshape(1, N), (1, N_pad))

    grid = (N_pad // tn, M_pad // tm, E_pad // tk)  # (J, I, K): M inner of the
    # output axes -> weight tile resident across the M sweep when K == 1.

    out = pl.pallas_call(
        _mlm_head_kernel,
        out_shape=jax.ShapeDtypeStruct((M_pad, N_pad), out_dtype),
        grid_spec=pltpu.PrefetchScalarGridSpec(
            num_scalar_prefetch=0,
            grid=grid,
            in_specs=[
                pl.BlockSpec((tm, tk), lambda j, i, k: (i, k)),   # hidden (streamed)
                pl.BlockSpec((tn, tk), lambda j, i, k: (j, k)),   # weight (resident over i)
                pl.BlockSpec((1, tn), lambda j, i, k: (0, j)),    # bias
            ],
            out_specs=pl.BlockSpec((tm, tn), lambda j, i, k: (i, j)),
            scratch_shapes=[pltpu.VMEM((tm, tn), jnp.float32)],
        ),
        compiler_params=pltpu.CompilerParams(
            dimension_semantics=("parallel", "parallel", "arbitrary"),
        ),
    )(x2d, w, b2d)

    return out[:M, :N].reshape(B, S, N)


if __name__ == "__main__":
    # Small shapes consistent with the module's forward:
    #   hidden_states: [bz, seq_len, emb_dim]; decoder_weight: [n_items, emb_dim]
    bz, seq_len, emb_dim, n_items = 2, 8, 32, 256

    key = jax.random.PRNGKey(0)
    k_h, k_w, k_rest = jax.random.split(key, 3)

    hidden_states = jax.random.normal(k_h, (bz, seq_len, emb_dim), dtype=jnp.float32)
    decoder_weight = jax.random.normal(k_w, (n_items, emb_dim), dtype=jnp.float32) * 0.02
    bias = jnp.zeros((n_items,), dtype=jnp.float32)  # nn.Parameter(torch.zeros(n_items))

    ref = jnp.einsum("bse,ne->bsn", hidden_states, decoder_weight) + bias

    # 1) Exact-semantics path: f32 MXU operands (matches the PyTorch module).
    out_f32 = jax.block_until_ready(
        mlm_head(hidden_states, decoder_weight, bias, compute_dtype=jnp.float32))
    assert out_f32.shape == (bz, seq_len, n_items)
    assert np.allclose(np.asarray(out_f32), np.asarray(ref), atol=1e-4, rtol=1e-4)

    # 2) Default perf path: bf16 operands, f32 accumulation (looser tolerance).
    out_bf16 = jax.block_until_ready(mlm_head(hidden_states, decoder_weight, bias))
    assert out_bf16.shape == (bz, seq_len, n_items)
    assert np.allclose(np.asarray(out_bf16), np.asarray(ref), atol=2e-2, rtol=2e-2)

    # 3) Unaligned shapes + tiny tiles: exercises zero-padding, a multi-tile grid,
    #    and the K-tiled accumulator path (grid = (3, 2, 2)).
    bz2, sl2, e2, n2 = 2, 8, 160, 300
    k1, k2 = jax.random.split(k_rest)
    h2 = jax.random.normal(k1, (bz2, sl2, e2), dtype=jnp.float32)
    w2 = jax.random.normal(k2, (n2, e2), dtype=jnp.float32) * 0.02
    b2 = jnp.linspace(-0.1, 0.1, n2, dtype=jnp.float32)
    ref2 = jnp.einsum("bse,ne->bsn", h2, w2) + b2
    out2 = jax.block_until_ready(
        mlm_head(h2, w2, b2, tm=8, tn=128, tk=128, compute_dtype=jnp.float32))
    assert out2.shape == (bz2, sl2, n2)
    assert np.allclose(np.asarray(out2), np.asarray(ref2), atol=2e-3, rtol=2e-3)

    print("KERNEL_OK")
</pallas_src>

<mosaic_0001>
module attributes {stable_mosaic.version = 11 : i64} {
  func.func @_mlm_head_kernel(%arg0: i32, %arg1: i32, %arg2: i32, %arg3: memref<16x128xf32, #tpu.memory_space<vmem>>, %arg4: memref<256x128xf32, #tpu.memory_space<vmem>>, %arg5: memref<1x256xf32, #tpu.memory_space<vmem>>, %arg6: memref<16x256xf32, #tpu.memory_space<vmem>>, %arg7: memref<16x256xf32, #tpu.memory_space<vmem>>) attributes {dimension_semantics = [#tpu.dimension_semantics<parallel>, #tpu.dimension_semantics<parallel>, #tpu.dimension_semantics<arbitrary>], iteration_bounds = array<i64: 1, 1, 1>, scalar_prefetch = 0 : i64, scratch_operands = 1 : i64, tpu.core_type = #tpu.core_type<tc>, window_params = [{transform_indices = @transform_0, window_bounds = array<i64: 16, 128>}, {transform_indices = @transform_1, window_bounds = array<i64: 256, 128>}, {transform_indices = @transform_2, window_bounds = array<i64: 1, 256>}, {transform_indices = @transform_3, window_bounds = array<i64: 16, 256>}]} {
    %c0_i32 = arith.constant 0 : i32
    %0 = arith.cmpi eq, %arg2, %c0_i32 : i32
    %1 = arith.extui %0 : i1 to i32
    %c0_i32_0 = arith.constant 0 : i32
    %2 = arith.cmpi ne, %1, %c0_i32_0 : i32
    scf.if %2 {
      %cst_10 = arith.constant 0.000000e+00 : f32
      %12 = vector.broadcast %cst_10 : f32 to vector<16x256xf32>
      %c0_11 = arith.constant 0 : index
      %c0_12 = arith.constant 0 : index
      %13 = vector.load %arg7[%c0_11, %c0_12] : memref<16x256xf32, #tpu.memory_space<vmem>>, vector<16x256xf32>
      tpu.vector_store %arg7[%c0_11, %c0_12], %12 {strides = array<i32>} : memref<16x256xf32, #tpu.memory_space<vmem>>, vector<16x256xf32>,
    } else {
    }
    %c0 = arith.constant 0 : index
    %c0_1 = arith.constant 0 : index
    %3 = vector.load %arg7[%c0, %c0_1] : memref<16x256xf32, #tpu.memory_space<vmem>>, vector<16x256xf32>
    %c0_2 = arith.constant 0 : index
    %c0_3 = arith.constant 0 : index
    %4 = vector.load %arg3[%c0_2, %c0_3] : memref<16x128xf32, #tpu.memory_space<vmem>>, vector<16x128xf32>
    %c0_4 = arith.constant 0 : index
    %c0_5 = arith.constant 0 : index
    %5 = vector.load %arg4[%c0_4, %c0_5] : memref<256x128xf32, #tpu.memory_space<vmem>>, vector<256x128xf32>
    %cst = arith.constant dense<0.000000e+00> : vector<16x256xf32>
    %6 = tpu.matmul %4, %5, %cst {dimension_numbers = #tpu.dot_dimension_numbers<[1], [1], [0], [0], [0, 0, 1, 0], [], []>} : vector<16x128xf32>, vector<256x128xf32>, vector<16x256xf32> -> vector<16x256xf32>
    %7 = arith.addf %3, %6 : vector<16x256xf32>
    %c0_6 = arith.constant 0 : index
    %c0_7 = arith.constant 0 : index
    %8 = vector.load %arg7[%c0_6, %c0_7] : memref<16x256xf32, #tpu.memory_space<vmem>>, vector<16x256xf32>
    tpu.vector_store %arg7[%c0_6, %c0_7], %7 {strides = array<i32>} : memref<16x256xf32, #tpu.memory_space<vmem>>, vector<16x256xf32>,
    %c0_i32_8 = arith.constant 0 : i32
    %9 = arith.cmpi eq, %arg2, %c0_i32_8 : i32
    %10 = arith.extui %9 : i1 to i32
    %c0_i32_9 = arith.constant 0 : i32
    %11 = arith.cmpi ne, %10, %c0_i32_9 : i32
    scf.if %11 {
      %c0_10 = arith.constant 0 : index
      %c0_11 = arith.constant 0 : index
      %12 = vector.load %arg7[%c0_10, %c0_11] : memref<16x256xf32, #tpu.memory_space<vmem>>, vector<16x256xf32>
      %c0_12 = arith.constant 0 : index
      %c0_13 = arith.constant 0 : index
      %13 = vector.load %arg5[%c0_12, %c0_13] : memref<1x256xf32, #tpu.memory_space<vmem>>, vector<1x256xf32>
      %14 = vector.broadcast %13 : vector<1x256xf32> to vector<16x256xf32>
      %15 = arith.addf %12, %14 : vector<16x256xf32>
      %c0_14 = arith.constant 0 : index
      %c0_15 = arith.constant 0 : index
      %16 = vector.load %arg6[%c0_14, %c0_15] : memref<16x256xf32, #tpu.memory_space<vmem>>, vector<16x256xf32>
      tpu.vector_store %arg6[%c0_14, %c0_15], %15 {strides = array<i32>} : memref<16x256xf32, #tpu.memory_space<vmem>>, vector<16x256xf32>,
    } else {
    }
    return
  }
  func.func @transform_0(%arg0: i32, %arg1: i32, %arg2: i32) -> (i32, i32) {
    %c0_i32 = arith.constant 0 : i32
    return %arg1, %arg2 : i32, i32
  }
  func.func @transform_1(%arg0: i32, %arg1: i32, %arg2: i32) -> (i32, i32) {
    %c0_i32 = arith.constant 0 : i32
    return %arg0, %arg2 : i32, i32
  }
  func.func @transform_2(%arg0: i32, %arg1: i32, %arg2: i32) -> (i32, i32) {
    %c0_i32 = arith.constant 0 : i32
    %c0_i32_0 = arith.constant 0 : i32
    return %c0_i32, %arg0 : i32, i32
  }
  func.func @transform_3(%arg0: i32, %arg1: i32, %arg2: i32) -> (i32, i32) {
    %c0_i32 = arith.constant 0 : i32
    return %arg1, %arg0 : i32, i32
  }
}

</mosaic_0001>

<bundles_post_ra>
// kernel: tpu_custom_call.1
= control target key start
LH: loop header
LB: loop body
LE: loop exit
PB: predicated region body
PF: predicated region fallthrough
CT: control target
= control target key end

     0   :  { %8 = vsyncpa [#allocation4], 0  ;;  %s383_s0 = inlined_call_operand.hbm [shape: f32[16,128], index: 0, kind: input, shape index: {}]   ;;  %s384_s1 = inlined_call_operand.hbm [shape: f32[256,128], index: 1, kind: input, shape index: {}]   ;;  %s385_s2 = inlined_call_operand.hbm [shape: f32[1,256], index: 2, kind: input, shape index: {}]   ;;  %s386_s3 = inlined_call_operand.hbm [shape: f32[16,256], index: 3, kind: output, shape index: {}]  }
   0x1   :  { %9 = vsyncpa [#allocation7], 0 }
   0x2   :  { %10 = vsyncpa [#allocation5], 0  ;;  %s28_s14 = sshll.u32 %s384_s1, 4  ;;  %s343_s15 = smov [#allocation6]   ;;  %s29_s14 = int_to_ptr.hbm [resolvable:$true] %s28_s14 }
   0x3   :  { %s30_s16 = sshll.u32 %s343_s15, 4  ;;  %s15_s19 = sshll.u32 %s383_s0, 4  ;;  %s31_s16 = int_to_ptr.vmem [resolvable:$true] %s30_s16  ;;  %s16_s19 = int_to_ptr.hbm [resolvable:$true] %s15_s19 }
   0x4   :  { %s344_s20 = smov 128   ;;  %s345_s21 = smov 8  }
   0x5   :  { %36 = dma.hbm_to_vmem [thread:$0]  %s29_s14, 4096, %s31_s16, [#allocation7], %s344_s20, %s344_s20, %s345_s21  }
   0x6   :  { %s346_s22 = smov [#allocation3]   ;;  %s42_s26 = sshll.u32 %s385_s2, 4  ;;  %s43_s26 = int_to_ptr.hbm [resolvable:$true] %s42_s26 }
   0x7   :  { %s17_s23 = sshll.u32 %s346_s22, 4  ;;  %s347_s1 = smov [#allocation8]   ;;  %s18_s23 = int_to_ptr.vmem [resolvable:$true] %s17_s23 }
   0x8   :  { %23 = dma.hbm_to_vmem [thread:$0]  %s16_s19, 256, %s18_s23, [#allocation4], %s344_s20, %s344_s20, %s345_s21  }
   0x9   :  { %s44_s27 = sshll.u32 %s347_s1, 4  ;;  %s45_s27 = int_to_ptr.vmem [resolvable:$true] %s44_s27 }
   0xa   :  { %47 = dma.hbm_to_vmem [thread:$0]  %s43_s26, 32, %s45_s27, [#allocation7]  }
   0xb   :  { %337 = dma.done.wait [#allocation4], 256  }
   0xc   :  { %338 = vsyncadd [#allocation4], 4294967040 }
   0xd   :  { %339 = dma.done.wait [#allocation7], 4128  }
   0xe   :  { %340 = vsyncadd [#allocation7], 4294963168  ;;  %v89_v0 = vld [vmem:[#allocation6 + $0x78] sm:$0xff]  ;;  %v88_v2 = vld [vmem:[#allocation6 + $0x70] sm:$0xff]  ;;  %s348_s0 = smov [#allocation9]   ;;  %s187_s30 = sshll.u32 %s386_s3, 4  ;;  %s188_s30 = int_to_ptr.hbm [resolvable:$true] %s187_s30 }
   0xf   :  { %v105_v1 = vld [vmem:[#allocation6 + $0xf8] sm:$0xff]  ;;  %201 = vmatpush.xpose.msra.mxu2 %v89_v0  ;;  %v104_v3 = vld [vmem:[#allocation6 + $0xf0] sm:$0xff]  ;;  %106 = vmatpush.xpose.msra.mxu0 %v89_v0  ;;  %v87_v4 = vld [vmem:[#allocation6 + $0x68] sm:$0xff]  ;;  %s185_s2 = sshll.u32 %s348_s0, 4  ;;  %s349_s4 = smov 256   ;;  %s186_s2 = int_to_ptr.vmem [resolvable:$true] %s185_s2 }
  0x10   :  { %217 = vmatpush.xpose.msra.mxu3 %v105_v1  ;;  %129 = vmatpush.xpose.msra.mxu1 %v105_v1  ;;  %v103_v5 = vld [vmem:[#allocation6 + $0xe8] sm:$0xff]  ;;  %v86_v6 = vld [vmem:[#allocation6 + $0x60] sm:$0xff]  ;;  %v85_v8 = vld [vmem:[#allocation6 + $0x58] sm:$0xff]  ;;  %s350_s5 = smov 16  }
  0x11   :  { %v102_v7 = vld [vmem:[#allocation6 + $0xe0] sm:$0xff]  ;;  %v101_v9 = vld [vmem:[#allocation6 + $0xd8] sm:$0xff]  ;;  %v84_v10 = vld [vmem:[#allocation6 + $0x50] sm:$0xff] }
  0x12   :  { %v100_v11 = vld [vmem:[#allocation6 + $0xd0] sm:$0xff]  ;;  %v83_v12 = vld [vmem:[#allocation6 + $0x48] sm:$0xff]  ;;  %v82_v14 = vld [vmem:[#allocation6 + $0x40] sm:$0xff] }
  0x13   :  { %202 = vmatpush.xpose.msra.mxu2 %v88_v2  ;;  %107 = vmatpush.xpose.msra.mxu0 %v88_v2  ;;  %v99_v13 = vld [vmem:[#allocation6 + $0xc8] sm:$0xff]  ;;  %v98_v15 = vld [vmem:[#allocation6 + $0xc0] sm:$0xff]  ;;  %v81_v16 = vld [vmem:[#allocation6 + $0x38] sm:$0xff] }
  0x14   :  { %218 = vmatpush.xpose.msra.mxu3 %v104_v3  ;;  %130 = vmatpush.xpose.msra.mxu1 %v104_v3  ;;  %v97_v17 = vld [vmem:[#allocation6 + $0xb8] sm:$0xff]  ;;  %v80_v18 = vld [vmem:[#allocation6 + $0x30] sm:$0xff]  ;;  %v79_v20 = vld [vmem:[#allocation6 + $0x28] sm:$0xff] }
  0x15   :  { %v96_v19 = vld [vmem:[#allocation6 + $0xb0] sm:$0xff]  ;;  %v95_v21 = vld [vmem:[#allocation6 + $0xa8] sm:$0xff]  ;;  %v78_v22 = vld [vmem:[#allocation6 + $0x20] sm:$0xff] }
  0x16   :  { %v94_v23 = vld [vmem:[#allocation6 + $0xa0] sm:$0xff]  ;;  %v77_v24 = vld [vmem:[#allocation6 + $0x18] sm:$0xff]  ;;  %v76_v26 = vld [vmem:[#allocation6 + $0x10] sm:$0xff] }
  0x17   :  { %203 = vmatpush.xpose.msra.mxu2 %v87_v4  ;;  %108 = vmatpush.xpose.msra.mxu0 %v87_v4  ;;  %v93_v25 = vld [vmem:[#allocation6 + $0x98] sm:$0xff]  ;;  %v92_v27 = vld [vmem:[#allocation6 + $0x90] sm:$0xff]  ;;  %v75_v28 = vld [vmem:[#allocation6 + $0x8] sm:$0xff] }
  0x18   :  { %219 = vmatpush.xpose.msra.mxu3 %v103_v5  ;;  %131 = vmatpush.xpose.msra.mxu1 %v103_v5  ;;  %v91_v29 = vld [vmem:[#allocation6 + $0x88] sm:$0xff]  ;;  %v74_v30 = vld [vmem:[#allocation6] sm:$0xff]  ;;  %v73_v32 = vld [vmem:[#allocation3 + $0x8] sm:$0xff] }
  0x19   :  { %v90_v31 = vld [vmem:[#allocation6 + $0x80] sm:$0xff]  ;;  %v72_v33 = vld [vmem:[#allocation3] sm:$0xff] }
  0x1a   :  { %v167_v34 = vld [vmem:[#allocation8] sm:$0x3] }
  0x1b   :  { %204 = vmatpush.xpose.msra.mxu2 %v86_v6  ;;  %109 = vmatpush.xpose.msra.mxu0 %v86_v6  ;;  %v169_v35 = vperm.slane %v167_v34, 0  ;;  %v170_v36 = vperm.slane %v167_v34, 1 }
  0x1c   :  { %220 = vmatpush.xpose.msra.mxu3 %v102_v7  ;;  %132 = vmatpush.xpose.msra.mxu1 %v102_v7 }
  0x1f   :  { %205 = vmatpush.xpose.msra.mxu2 %v85_v8  ;;  %110 = vmatpush.xpose.msra.mxu0 %v85_v8 }
  0x20   :  { %221 = vmatpush.xpose.msra.mxu3 %v101_v9  ;;  %133 = vmatpush.xpose.msra.mxu1 %v101_v9 }
  0x23   :  { %206 = vmatpush.xpose.msra.mxu2 %v84_v10  ;;  %111 = vmatpush.xpose.msra.mxu0 %v84_v10 }
  0x24   :  { %222 = vmatpush.xpose.msra.mxu3 %v100_v11  ;;  %134 = vmatpush.xpose.msra.mxu1 %v100_v11 }
  0x27   :  { %207 = vmatpush.xpose.msra.mxu2 %v83_v12  ;;  %112 = vmatpush.xpose.msra.mxu0 %v83_v12 }
  0x28   :  { %223 = vmatpush.xpose.msra.mxu3 %v99_v13  ;;  %135 = vmatpush.xpose.msra.mxu1 %v99_v13 }
  0x2b   :  { %208 = vmatpush.xpose.msra.mxu2 %v82_v14  ;;  %113 = vmatpush.xpose.msra.mxu0 %v82_v14 }
  0x2c   :  { %224 = vmatpush.xpose.msra.mxu3 %v98_v15  ;;  %136 = vmatpush.xpose.msra.mxu1 %v98_v15 }
  0x2f   :  { %209 = vmatpush.xpose.msra.mxu2 %v81_v16  ;;  %114 = vmatpush.xpose.msra.mxu0 %v81_v16 }
  0x30   :  { %225 = vmatpush.xpose.msra.mxu3 %v97_v17  ;;  %137 = vmatpush.xpose.msra.mxu1 %v97_v17 }
  0x33   :  { %210 = vmatpush.xpose.msra.mxu2 %v80_v18  ;;  %115 = vmatpush.xpose.msra.mxu0 %v80_v18 }
  0x34   :  { %226 = vmatpush.xpose.msra.mxu3 %v96_v19  ;;  %138 = vmatpush.xpose.msra.mxu1 %v96_v19 }
  0x37   :  { %211 = vmatpush.xpose.msra.mxu2 %v79_v20  ;;  %116 = vmatpush.xpose.msra.mxu0 %v79_v20 }
  0x38   :  { %227 = vmatpush.xpose.msra.mxu3 %v95_v21  ;;  %139 = vmatpush.xpose.msra.mxu1 %v95_v21 }
  0x3b   :  { %212 = vmatpush.xpose.msra.mxu2 %v78_v22  ;;  %117 = vmatpush.xpose.msra.mxu0 %v78_v22 }
  0x3c   :  { %228 = vmatpush.xpose.msra.mxu3 %v94_v23  ;;  %140 = vmatpush.xpose.msra.mxu1 %v94_v23 }
  0x3f   :  { %213 = vmatpush.xpose.msra.mxu2 %v77_v24  ;;  %118 = vmatpush.xpose.msra.mxu0 %v77_v24 }
  0x40   :  { %229 = vmatpush.xpose.msra.mxu3 %v93_v25  ;;  %141 = vmatpush.xpose.msra.mxu1 %v93_v25 }
  0x43   :  { %214 = vmatpush.xpose.msra.mxu2 %v76_v26  ;;  %119 = vmatpush.xpose.msra.mxu0 %v76_v26 }
  0x44   :  { %230 = vmatpush.xpose.msra.mxu3 %v92_v27  ;;  %142 = vmatpush.xpose.msra.mxu1 %v92_v27 }
  0x47   :  { %215 = vmatpush.xpose.msra.mxu2 %v75_v28  ;;  %120 = vmatpush.xpose.msra.mxu0 %v75_v28 }
  0x48   :  { %231 = vmatpush.xpose.msra.mxu3 %v91_v29  ;;  %143 = vmatpush.xpose.msra.mxu1 %v91_v29 }
  0x4b   :  { %216 = vmatpush.xpose.msra.mxu2 %v74_v30  ;;  %121 = vmatpush.xpose.msra.mxu0 %v74_v30 }
  0x4c   :  { %232 = vmatpush.xpose.msra.mxu3 %v90_v31  ;;  %144 = vmatpush.xpose.msra.mxu1 %v90_v31 }
  0x4e   :  { %125 = vmatmul.f32.vlgmr.msra.gmra.mxu2 %v73_v32  ;;  %122 = vmatmul.f32.vlgmr.msra.gmra.mxu0 %v72_v33 }
  0x4f   :  { %148 = vmatmul.f32.vlgmr.msra.gmra.mxu3 %v73_v32  ;;  %145 = vmatmul.f32.vlgmr.msra.gmra.mxu1 %v72_v33 }
  0xcb   :  { %v123_v37 = vpop.f32.mrf.mxu0 }
  0xcc   :  { %v146_v38 = vpop.f32.mrf.mxu1  ;;  %v173_v39 = vadd.f32 %v169_v35, %v123_v37 }
  0xcd   :  { %v174_v40 = vadd.f32 %v170_v36, %v146_v38 }
  0xce   :  { %177 = vst [vmem:[#allocation9] sm:$0xff] %v173_v39 }
  0xcf   :  { %178 = vst [vmem:[#allocation9 + $0x8] sm:$0xff] %v174_v40 }
  0xd1   :  { %v126_v41 = vpop.f32.mrf.mxu2 }
  0xd2   :  { %v149_v42 = vpop.f32.mrf.mxu3  ;;  %v175_v43 = vadd.f32 %v169_v35, %v126_v41 }
  0xd3   :  { %v176_v44 = vadd.f32 %v170_v36, %v149_v42 }
  0xd4   :  { %179 = vst [vmem:[#allocation9 + $0x10] sm:$0xff] %v175_v43 }
  0xd5   :  { %180 = vst [vmem:[#allocation9 + $0x18] sm:$0xff] %v176_v44 }
  0xd6   :  { %193 = dma.vmem_to_hbm [thread:$0]  %s186_s2, 512, %s188_s30, [#allocation5], %s349_s4, %s349_s4, %s350_s5  }
  0xd7   :  { %341 = dma.done.wait [#allocation5], 512  }
  0xd8   :  { %342 = vsyncadd [#allocation5], 4294966784 }
  0xd9   :  { %198 = vsyncpa [#allocation4], 1 }
  0xda   :  { %199 = vsyncpa [#allocation7], 1 }
  0xdb   :  { %200 = vsyncpa [#allocation5], 1 }

</bundles_post_ra>
